<compile_context>
chip_gen: v7x
topology: tpu7x:2x2x1
jax: 0.10.0
libtpu: 0.0.40
codegen_flags: <defaults>
</compile_context>

<pallas_src>
import jax
import jax.numpy as jnp
from jax.experimental import pallas as pl
from jax.experimental.pallas import tpu as pltpu

# ---- configuration (DDPGCritic(num_obs=6, n_neurons=16, num_actions=2)) ----
NUM_OBS = 6
NUM_ACTIONS = 2
N_NEURONS = 16
OUT_FEATURES = 1

IN_FEATURES = NUM_OBS + NUM_ACTIONS              # 8
N_COMMAND = max(int(0.4 * N_NEURONS), 1)         # 6
N_INTER = N_NEURONS - N_COMMAND                  # 10
N_MOTOR = OUT_FEATURES                           # 1
N_UNITS = N_NEURONS + OUT_FEATURES               # 17
H_AUG = N_UNITS + 1                              # 18 (hidden ++ bias-ones row,
                                                 #     also new_h ++ q on output)


def _round_up(x, m):
    return ((x + m - 1) // m) * m


# Sublane-padded head widths (each head starts on an 8-sublane boundary).
HP1 = _round_up(N_INTER, 8)                      # 16
HP2 = _round_up(N_COMMAND, 8)                    # 8
HP3 = _round_up(N_MOTOR, 8)                      # 8
W1P = 4 * HP1                                    # 64   (heads g, h, f, proj)
W2P = 4 * HP2                                    # 32
W3P = 4 * HP3                                    # 32
W_ALLP = W1P + W2P + W3P                         # 128


def _liquid_cell(z, hp):
    """CfC-style gating, feature-major layout.  z: (4*hp, bt), heads stacked
    along the sublane axis at 8-aligned offsets [g, h, f, proj] (f = fg + fh
    was folded offline; exact because the add happens before the sigmoid)."""
    g = jnp.tanh(z[0 * hp:1 * hp, :])
    hh = jnp.tanh(z[1 * hp:2 * hp, :])
    gate = jax.nn.sigmoid(z[2 * hp:3 * hp, :])
    proj = z[3 * hp:4 * hp, :]
    new_h = g + gate * (hh - g)                  # == g*(1-gate) + hh*gate
    return proj + new_h, new_h


def ddpg_critic_kernel(x_ref, h_ref, wx1t_ref, wx2t_ref, wx3t_ref, whbdt_ref,
                       out_ref):
    # Batch on lanes, features on sublanes.  Cast up immediately so all
    # VPU/EUP math stays f32 (required on v5e, cheap elsewhere).
    x = x_ref[...].astype(jnp.float32)           # (IN_FEATURES, bt)
    h = h_ref[...].astype(jnp.float32)           # (H_AUG, bt); last row = ones

    # Recurrent contributions of all three cells + all biases in ONE matmul
    # (bias via the ones row).  No dependence on y1/y2 -> off the serial chain.
    zh = jnp.dot(whbdt_ref[...], h, preferred_element_type=jnp.float32)  # (128, bt)

    # ---- cell 1 (inter) ----
    z1 = jnp.dot(wx1t_ref[...], x, preferred_element_type=jnp.float32) + zh[0:W1P, :]
    y1, nh1 = _liquid_cell(z1, HP1)              # (HP1, bt); padded rows are 0

    # ---- cell 2 (command) ----
    z2 = (jnp.dot(wx2t_ref[...], y1, preferred_element_type=jnp.float32)
          + zh[W1P:W1P + W2P, :])
    y2, nh2 = _liquid_cell(z2, HP2)

    # ---- cell 3 (motor) -> q value ----
    # TODO(synk): this (32,8)@(8,bt) matmul could become VPU broadcast-MACs to
    # skip one MXU round trip on the serial chain; negligible at this size.
    z3 = (jnp.dot(wx3t_ref[...], y2, preferred_element_type=jnp.float32)
          + zh[W1P + W2P:W_ALLP, :])
    y3, nh3 = _liquid_cell(z3, HP3)

    # Single fused, lane-dense store: rows [0:N_UNITS] = new hidden, row 17 = q.
    out_ref[...] = jnp.concatenate(
        [nh1[:N_INTER, :], nh2[:N_COMMAND, :], nh3[:N_MOTOR, :], y3[:N_MOTOR, :]],
        axis=0)


def ddpg_critic_forward(params, obs, actions, hidden=None, *,
                        batch_tile=1024, stream_bf16=False):
    """Forward pass. Returns (q_values (B,1), new_hidden (B, N_UNITS))."""
    assert batch_tile % 128 == 0 and batch_tile >= 128, (
        "batch_tile must be a positive multiple of 128 (batch lives on the "
        "lane axis)")
    B = obs.shape[0]
    if hidden is None:
        hidden = jnp.zeros((B, N_UNITS), jnp.float32)

    wire_dt = jnp.bfloat16 if stream_bf16 else jnp.float32

    # Feature-major activations; ones row carries the (folded) bias.
    xT = jnp.concatenate([obs.T.astype(wire_dt),
                          actions.T.astype(wire_dt)], axis=0)        # (8, B)
    hT = jnp.concatenate([hidden.T.astype(wire_dt),
                          jnp.ones((1, B), wire_dt)], axis=0)        # (18, B)

    # Batch tile: multiple of 128 lanes; when B spans >= 2 lane groups, make
    # the grid have >= 2 "parallel" steps so v7x can shard across both TCs.
    n128 = _round_up(B, 128) // 128
    bt = 128 if n128 <= 1 else min(batch_tile, 128 * ((n128 + 1) // 2))
    Bp = _round_up(B, bt)
    if Bp != B:
        xT = jnp.pad(xT, ((0, 0), (0, Bp - B)))
        hT = jnp.pad(hT, ((0, 0), (0, Bp - B)))

    grid = (Bp // bt,)
    batch_map = lambda i: (0, i)
    const_map = lambda i: (0, 0)          # weights stay VMEM-resident

    out = pl.pallas_call(
        ddpg_critic_kernel,
        grid=grid,
        in_specs=[
            pl.BlockSpec((IN_FEATURES, bt), batch_map),
            pl.BlockSpec((H_AUG, bt), batch_map),
            pl.BlockSpec((W1P, IN_FEATURES), const_map),
            pl.BlockSpec((W2P, HP1), const_map),
            pl.BlockSpec((W3P, HP2), const_map),
            pl.BlockSpec((W_ALLP, H_AUG), const_map),
        ],
        out_specs=pl.BlockSpec((H_AUG, bt), batch_map),
        out_shape=jax.ShapeDtypeStruct((H_AUG, Bp), jnp.float32),
        compiler_params=pltpu.CompilerParams(
            dimension_semantics=("parallel",)),
    )(xT, hT, params["wx1t"], params["wx2t"], params["wx3t"], params["whbdt"])

    new_hidden = out[:N_UNITS, :B].T
    q = out[N_UNITS:H_AUG, :B].T
    return q, new_hidden


# ----------------------------- parameters -----------------------------------
def init_raw_params(key):
    """Raw 5-head weights per cell (nn.Linear-style init, NCP input-sparsity
    masks folded into the input weights)."""
    def uni(k, shape, bound):
        return jax.random.uniform(k, shape, jnp.float32, -bound, bound)

    keys = iter(jax.random.split(key, 12))
    raw = {}

    # cell 1: (obs ++ actions) -> inter
    k1 = 1.0 / float(IN_FEATURES + N_INTER) ** 0.5
    mask1 = (jax.random.uniform(next(keys), (IN_FEATURES, N_INTER)) > 0.5
             ).astype(jnp.float32)
    raw["wx1"] = uni(next(keys), (IN_FEATURES, 5 * N_INTER), k1) * jnp.tile(mask1, (1, 5))
    raw["wh1"] = uni(next(keys), (N_INTER, 5 * N_INTER), k1)
    raw["b1"] = uni(next(keys), (1, 5 * N_INTER), k1)

    # cell 2: inter -> command
    k2 = 1.0 / float(N_INTER + N_COMMAND) ** 0.5
    mask2 = (jax.random.uniform(next(keys), (N_INTER, N_COMMAND)) > 0.5
             ).astype(jnp.float32)
    raw["wx2"] = uni(next(keys), (N_INTER, 5 * N_COMMAND), k2) * jnp.tile(mask2, (1, 5))
    raw["wh2"] = uni(next(keys), (N_COMMAND, 5 * N_COMMAND), k2)
    raw["b2"] = uni(next(keys), (1, 5 * N_COMMAND), k2)

    # cell 3: command -> motor (q value)
    k3 = 1.0 / float(N_COMMAND + N_MOTOR) ** 0.5
    mask3 = (jax.random.uniform(next(keys), (N_COMMAND, N_MOTOR)) > 0.5
             ).astype(jnp.float32)
    raw["wx3"] = uni(next(keys), (N_COMMAND, 5 * N_MOTOR), k3) * jnp.tile(mask3, (1, 5))
    raw["wh3"] = uni(next(keys), (N_MOTOR, 5 * N_MOTOR), k3)
    raw["b3"] = uni(next(keys), (1, 5 * N_MOTOR), k3)
    return raw


def _fold_heads(w, hid):
    """5 heads [g, h, fg, fh, proj] -> 4 heads [g, h, fg+fh, proj] (exact)."""
    return jnp.concatenate(
        [w[:, 0 * hid:1 * hid],
         w[:, 1 * hid:2 * hid],
         w[:, 2 * hid:3 * hid] + w[:, 3 * hid:4 * hid],
         w[:, 4 * hid:5 * hid]], axis=-1)


def _pad_heads(w4, hid, hp):
    """(fan_in, 4*hid) -> (fan_in, 4*hp): zero-pad every head to hp columns so
    each head starts on an 8-sublane boundary after transposition."""
    fan_in = w4.shape[0]
    out = jnp.zeros((fan_in, 4 * hp), w4.dtype)
    for k in range(4):
        out = out.at[:, k * hp:k * hp + hid].set(w4[:, k * hid:(k + 1) * hid])
    return out


def pack_params(raw):
    """Pure parameter prep outside the kernel: fold forget heads, pad heads to
    8-sublane slots, transpose to feature-major, fuse biases into the
    block-diagonal recurrent matrix via a ones-row trick."""
    def prep(w, hid, hp):
        return _pad_heads(_fold_heads(w, hid), hid, hp)

    wx1 = prep(raw["wx1"], N_INTER, HP1)        # (8, 64)
    wx2 = prep(raw["wx2"], N_COMMAND, HP2)      # (10, 32)
    wx3 = prep(raw["wx3"], N_MOTOR, HP3)        # (6, 32)
    wh1 = prep(raw["wh1"], N_INTER, HP1)        # (10, 64)
    wh2 = prep(raw["wh2"], N_COMMAND, HP2)      # (6, 32)
    wh3 = prep(raw["wh3"], N_MOTOR, HP3)        # (1, 32)
    b1 = prep(raw["b1"], N_INTER, HP1)[0]       # (64,)
    b2 = prep(raw["b2"], N_COMMAND, HP2)[0]     # (32,)
    b3 = prep(raw["b3"], N_MOTOR, HP3)[0]       # (32,)

    wx1t = wx1.T                                                     # (64, 8)
    wx2t = jnp.zeros((W2P, HP1), jnp.float32).at[:, :N_INTER].set(wx2.T)    # (32, 16)
    wx3t = jnp.zeros((W3P, HP2), jnp.float32).at[:, :N_COMMAND].set(wx3.T)  # (32, 8)

    # Block-diagonal recurrent matrix (transposed) with a trailing bias column.
    whbdt = jnp.zeros((W_ALLP, H_AUG), jnp.float32)                  # (128, 18)
    whbdt = whbdt.at[0:W1P, 0:N_INTER].set(wh1.T)
    whbdt = whbdt.at[W1P:W1P + W2P, N_INTER:N_INTER + N_COMMAND].set(wh2.T)
    whbdt = whbdt.at[W1P + W2P:W_ALLP, N_INTER + N_COMMAND:N_UNITS].set(wh3.T)
    whbdt = whbdt.at[0:W1P, N_UNITS].set(b1)
    whbdt = whbdt.at[W1P:W1P + W2P, N_UNITS].set(b2)
    whbdt = whbdt.at[W1P + W2P:W_ALLP, N_UNITS].set(b3)

    return {"wx1t": wx1t, "wx2t": wx2t, "wx3t": wx3t, "whbdt": whbdt}


# ----------------------------- reference ------------------------------------
def _reference_forward(raw, obs, actions, hidden):
    """Pure-JAX reference on the RAW (unfolded) parameters."""
    x = jnp.concatenate([obs, actions], axis=-1)
    hs = [hidden[:, :N_INTER],
          hidden[:, N_INTER:N_INTER + N_COMMAND],
          hidden[:, N_INTER + N_COMMAND:N_UNITS]]
    wxs = [raw["wx1"], raw["wx2"], raw["wx3"]]
    whs = [raw["wh1"], raw["wh2"], raw["wh3"]]
    bs = [raw["b1"], raw["b2"], raw["b3"]]
    hids = [N_INTER, N_COMMAND, N_MOTOR]
    new_hs = []
    for wx, wh, b, hid, h in zip(wxs, whs, bs, hids, hs):
        z = x @ wx + h @ wh + b
        g = jnp.tanh(z[:, :hid])
        hh = jnp.tanh(z[:, hid:2 * hid])
        gate = jax.nn.sigmoid(z[:, 2 * hid:3 * hid] + z[:, 3 * hid:4 * hid])
        new_h = g * (1.0 - gate) + hh * gate
        x = z[:, 4 * hid:5 * hid] + new_h
        new_hs.append(new_h)
    return x, jnp.concatenate(new_hs, axis=-1)


if __name__ == "__main__":
    key = jax.random.PRNGKey(0)
    pkey, okey, akey, hkey = jax.random.split(key, 4)

    raw = init_raw_params(pkey)
    params = pack_params(raw)

    # ---- small batch, hidden=None -> zero hidden state (single 128-lane block) ----
    B = 2
    obs = jax.random.normal(okey, (B, NUM_OBS), jnp.float32)
    actions = jax.random.normal(akey, (B, NUM_ACTIONS), jnp.float32)

    q, new_hidden = ddpg_critic_forward(params, obs, actions, hidden=None)
    q = jax.block_until_ready(q)
    new_hidden = jax.block_until_ready(new_hidden)
    assert q.shape == (B, OUT_FEATURES)
    assert new_hidden.shape == (B, N_UNITS)

    q_ref, h_ref = _reference_forward(raw, obs, actions,
                                      jnp.zeros((B, N_UNITS), jnp.float32))
    assert bool(jnp.allclose(q, q_ref, atol=1e-5, rtol=1e-5))
    assert bool(jnp.allclose(new_hidden, h_ref, atol=1e-5, rtol=1e-5))

    # ---- medium batch with explicit hidden (single block, lane padding) ----
    B2 = 20
    k0, k1, k2 = jax.random.split(hkey, 3)
    obs2 = jax.random.normal(k0, (B2, NUM_OBS), jnp.float32)
    act2 = jax.random.normal(k1, (B2, NUM_ACTIONS), jnp.float32)
    hid2 = 0.1 * jax.random.normal(k2, (B2, N_UNITS), jnp.float32)

    q2, nh2 = ddpg_critic_forward(params, obs2, act2, hid2)
    q2 = jax.block_until_ready(q2)
    nh2 = jax.block_until_ready(nh2)
    q2_ref, h2_ref = _reference_forward(raw, obs2, act2, hid2)
    assert q2.shape == (B2, OUT_FEATURES)
    assert nh2.shape == (B2, N_UNITS)
    assert bool(jnp.allclose(q2, q2_ref, atol=1e-5, rtol=1e-5))
    assert bool(jnp.allclose(nh2, h2_ref, atol=1e-5, rtol=1e-5))

    # ---- larger batch: exercises the multi-step "parallel" grid + padding ----
    B3 = 300
    k3, k4, k5 = jax.random.split(k2, 3)
    obs3 = jax.random.normal(k3, (B3, NUM_OBS), jnp.float32)
    act3 = jax.random.normal(k4, (B3, NUM_ACTIONS), jnp.float32)
    hid3 = 0.1 * jax.random.normal(k5, (B3, N_UNITS), jnp.float32)

    q3, nh3 = ddpg_critic_forward(params, obs3, act3, hid3)
    q3 = jax.block_until_ready(q3)
    nh3 = jax.block_until_ready(nh3)
    q3_ref, h3_ref = _reference_forward(raw, obs3, act3, hid3)
    assert q3.shape == (B3, OUT_FEATURES)
    assert nh3.shape == (B3, N_UNITS)
    assert bool(jnp.allclose(q3, q3_ref, atol=1e-5, rtol=1e-5))
    assert bool(jnp.allclose(nh3, h3_ref, atol=1e-5, rtol=1e-5))

    # ---- bf16-on-the-wire activation streaming (f32 compute in-kernel) ----
    q3b, nh3b = ddpg_critic_forward(params, obs3, act3, hid3, stream_bf16=True)
    q3b = jax.block_until_ready(q3b)
    nh3b = jax.block_until_ready(nh3b)
    assert bool(jnp.allclose(q3b, q3_ref, atol=3e-2, rtol=3e-2))
    assert bool(jnp.allclose(nh3b, h3_ref, atol=3e-2, rtol=3e-2))

    print("KERNEL_OK")
</pallas_src>

<mosaic_0001>
module attributes {stable_mosaic.version = 11 : i64} {
  func.func @ddpg_critic_kernel(%arg0: i32, %arg1: memref<8x128xf32, #tpu.memory_space<vmem>>, %arg2: memref<18x128xf32, #tpu.memory_space<vmem>>, %arg3: memref<64x8xf32, #tpu.memory_space<vmem>>, %arg4: memref<32x16xf32, #tpu.memory_space<vmem>>, %arg5: memref<32x8xf32, #tpu.memory_space<vmem>>, %arg6: memref<128x18xf32, #tpu.memory_space<vmem>>, %arg7: memref<18x128xf32, #tpu.memory_space<vmem>>) attributes {dimension_semantics = [#tpu.dimension_semantics<parallel>], iteration_bounds = array<i64: 1>, scalar_prefetch = 0 : i64, scratch_operands = 0 : i64, tpu.core_type = #tpu.core_type<tc>, window_params = [{transform_indices = @transform_0, window_bounds = array<i64: 8, 128>}, {transform_indices = @transform_1, window_bounds = array<i64: 18, 128>}, {pipeline_mode = #tpu.pipeline_mode<synchronous>, transform_indices = @transform_2, window_bounds = array<i64: 64, 8>}, {pipeline_mode = #tpu.pipeline_mode<synchronous>, transform_indices = @transform_3, window_bounds = array<i64: 32, 16>}, {pipeline_mode = #tpu.pipeline_mode<synchronous>, transform_indices = @transform_4, window_bounds = array<i64: 32, 8>}, {pipeline_mode = #tpu.pipeline_mode<synchronous>, transform_indices = @transform_5, window_bounds = array<i64: 128, 18>}, {transform_indices = @transform_6, window_bounds = array<i64: 18, 128>}]} {
    %c0 = arith.constant 0 : index
    %c0_0 = arith.constant 0 : index
    %0 = vector.load %arg1[%c0, %c0_0] : memref<8x128xf32, #tpu.memory_space<vmem>>, vector<8x128xf32>
    %c0_1 = arith.constant 0 : index
    %c0_2 = arith.constant 0 : index
    %1 = vector.load %arg2[%c0_1, %c0_2] : memref<18x128xf32, #tpu.memory_space<vmem>>, vector<18x128xf32>
    %c0_3 = arith.constant 0 : index
    %c0_4 = arith.constant 0 : index
    %2 = vector.load %arg6[%c0_3, %c0_4] : memref<128x18xf32, #tpu.memory_space<vmem>>, vector<128x18xf32>
    %cst = arith.constant dense<0.000000e+00> : vector<128x128xf32>
    %3 = tpu.matmul %2, %1, %cst {dimension_numbers = #tpu.dot_dimension_numbers<[1], [0], [0], [1], [0, 0, 1, 1], [], []>} : vector<128x18xf32>, vector<18x128xf32>, vector<128x128xf32> -> vector<128x128xf32>
    %c0_5 = arith.constant 0 : index
    %c0_6 = arith.constant 0 : index
    %4 = vector.load %arg3[%c0_5, %c0_6] : memref<64x8xf32, #tpu.memory_space<vmem>>, vector<64x8xf32>
    %cst_7 = arith.constant dense<0.000000e+00> : vector<64x128xf32>
    %5 = tpu.matmul %4, %0, %cst_7 {dimension_numbers = #tpu.dot_dimension_numbers<[1], [0], [0], [1], [0, 0, 1, 1], [], []>} : vector<64x8xf32>, vector<8x128xf32>, vector<64x128xf32> -> vector<64x128xf32>
    %6 = vector.extract_strided_slice %3 {offsets = [0, 0], sizes = [64, 128], strides = [1, 1]} : vector<128x128xf32> to vector<64x128xf32>
    %7 = arith.addf %5, %6 : vector<64x128xf32>
    %8 = vector.extract_strided_slice %7 {offsets = [0, 0], sizes = [16, 128], strides = [1, 1]} : vector<64x128xf32> to vector<16x128xf32>
    %9 = math.tanh %8 : vector<16x128xf32>
    %10 = vector.extract_strided_slice %7 {offsets = [16, 0], sizes = [16, 128], strides = [1, 1]} : vector<64x128xf32> to vector<16x128xf32>
    %11 = math.tanh %10 : vector<16x128xf32>
    %12 = vector.extract_strided_slice %7 {offsets = [32, 0], sizes = [16, 128], strides = [1, 1]} : vector<64x128xf32> to vector<16x128xf32>
    %13 = arith.negf %12 : vector<16x128xf32>
    %14 = math.exp %13 : vector<16x128xf32>
    %cst_8 = arith.constant 1.000000e+00 : f32
    %15 = vector.broadcast %cst_8 : f32 to vector<16x128xf32>
    %16 = arith.addf %15, %14 : vector<16x128xf32>
    %17 = arith.divf %15, %16 : vector<16x128xf32>
    %18 = vector.extract_strided_slice %7 {offsets = [48, 0], sizes = [16, 128], strides = [1, 1]} : vector<64x128xf32> to vector<16x128xf32>
    %19 = arith.subf %11, %9 : vector<16x128xf32>
    %20 = arith.mulf %17, %19 : vector<16x128xf32>
    %21 = arith.addf %9, %20 : vector<16x128xf32>
    %22 = arith.addf %18, %21 : vector<16x128xf32>
    %c0_9 = arith.constant 0 : index
    %c0_10 = arith.constant 0 : index
    %23 = vector.load %arg4[%c0_9, %c0_10] : memref<32x16xf32, #tpu.memory_space<vmem>>, vector<32x16xf32>
    %cst_11 = arith.constant dense<0.000000e+00> : vector<32x128xf32>
    %24 = tpu.matmul %23, %22, %cst_11 {dimension_numbers = #tpu.dot_dimension_numbers<[1], [0], [0], [1], [0, 0, 1, 1], [], []>} : vector<32x16xf32>, vector<16x128xf32>, vector<32x128xf32> -> vector<32x128xf32>
    %25 = vector.extract_strided_slice %3 {offsets = [64, 0], sizes = [32, 128], strides = [1, 1]} : vector<128x128xf32> to vector<32x128xf32>
    %26 = arith.addf %24, %25 : vector<32x128xf32>
    %27 = vector.extract_strided_slice %26 {offsets = [0, 0], sizes = [8, 128], strides = [1, 1]} : vector<32x128xf32> to vector<8x128xf32>
    %28 = math.tanh %27 : vector<8x128xf32>
    %29 = vector.extract_strided_slice %26 {offsets = [8, 0], sizes = [8, 128], strides = [1, 1]} : vector<32x128xf32> to vector<8x128xf32>
    %30 = math.tanh %29 : vector<8x128xf32>
    %31 = vector.extract_strided_slice %26 {offsets = [16, 0], sizes = [8, 128], strides = [1, 1]} : vector<32x128xf32> to vector<8x128xf32>
    %32 = arith.negf %31 : vector<8x128xf32>
    %33 = math.exp %32 : vector<8x128xf32>
    %cst_12 = arith.constant 1.000000e+00 : f32
    %34 = vector.broadcast %cst_12 : f32 to vector<8x128xf32>
    %35 = arith.addf %34, %33 : vector<8x128xf32>
    %36 = arith.divf %34, %35 : vector<8x128xf32>
    %37 = vector.extract_strided_slice %26 {offsets = [24, 0], sizes = [8, 128], strides = [1, 1]} : vector<32x128xf32> to vector<8x128xf32>
    %38 = arith.subf %30, %28 : vector<8x128xf32>
    %39 = arith.mulf %36, %38 : vector<8x128xf32>
    %40 = arith.addf %28, %39 : vector<8x128xf32>
    %41 = arith.addf %37, %40 : vector<8x128xf32>
    %c0_13 = arith.constant 0 : index
    %c0_14 = arith.constant 0 : index
    %42 = vector.load %arg5[%c0_13, %c0_14] : memref<32x8xf32, #tpu.memory_space<vmem>>, vector<32x8xf32>
    %cst_15 = arith.constant dense<0.000000e+00> : vector<32x128xf32>
    %43 = tpu.matmul %42, %41, %cst_15 {dimension_numbers = #tpu.dot_dimension_numbers<[1], [0], [0], [1], [0, 0, 1, 1], [], []>} : vector<32x8xf32>, vector<8x128xf32>, vector<32x128xf32> -> vector<32x128xf32>
    %44 = vector.extract_strided_slice %3 {offsets = [96, 0], sizes = [32, 128], strides = [1, 1]} : vector<128x128xf32> to vector<32x128xf32>
    %45 = arith.addf %43, %44 : vector<32x128xf32>
    %46 = vector.extract_strided_slice %45 {offsets = [0, 0], sizes = [8, 128], strides = [1, 1]} : vector<32x128xf32> to vector<8x128xf32>
    %47 = math.tanh %46 : vector<8x128xf32>
    %48 = vector.extract_strided_slice %45 {offsets = [8, 0], sizes = [8, 128], strides = [1, 1]} : vector<32x128xf32> to vector<8x128xf32>
    %49 = math.tanh %48 : vector<8x128xf32>
    %50 = vector.extract_strided_slice %45 {offsets = [16, 0], sizes = [8, 128], strides = [1, 1]} : vector<32x128xf32> to vector<8x128xf32>
    %51 = arith.negf %50 : vector<8x128xf32>
    %52 = math.exp %51 : vector<8x128xf32>
    %cst_16 = arith.constant 1.000000e+00 : f32
    %53 = vector.broadcast %cst_16 : f32 to vector<8x128xf32>
    %54 = arith.addf %53, %52 : vector<8x128xf32>
    %55 = arith.divf %53, %54 : vector<8x128xf32>
    %56 = vector.extract_strided_slice %45 {offsets = [24, 0], sizes = [8, 128], strides = [1, 1]} : vector<32x128xf32> to vector<8x128xf32>
    %57 = arith.subf %49, %47 : vector<8x128xf32>
    %58 = arith.mulf %55, %57 : vector<8x128xf32>
    %59 = arith.addf %47, %58 : vector<8x128xf32>
    %60 = arith.addf %56, %59 : vector<8x128xf32>
    %61 = vector.extract_strided_slice %21 {offsets = [0, 0], sizes = [10, 128], strides = [1, 1]} : vector<16x128xf32> to vector<10x128xf32>
    %62 = vector.extract_strided_slice %40 {offsets = [0, 0], sizes = [6, 128], strides = [1, 1]} : vector<8x128xf32> to vector<6x128xf32>
    %63 = vector.extract_strided_slice %59 {offsets = [0, 0], sizes = [1, 128], strides = [1, 1]} : vector<8x128xf32> to vector<1x128xf32>
    %64 = vector.extract_strided_slice %60 {offsets = [0, 0], sizes = [1, 128], strides = [1, 1]} : vector<8x128xf32> to vector<1x128xf32>
    %65 = tpu.concatenate %61, %62, %63, %64 in 0 : vector<10x128xf32>, vector<6x128xf32>, vector<1x128xf32>, vector<1x128xf32> -> vector<18x128xf32>
    %c0_17 = arith.constant 0 : index
    %c0_18 = arith.constant 0 : index
    %66 = vector.load %arg7[%c0_17, %c0_18] : memref<18x128xf32, #tpu.memory_space<vmem>>, vector<18x128xf32>
    tpu.vector_store %arg7[%c0_17, %c0_18], %65 {strides = array<i32>} : memref<18x128xf32, #tpu.memory_space<vmem>>, vector<18x128xf32>,
    return
  }
  func.func @transform_0(%arg0: i32) -> (i32, i32) {
    %c0_i32 = arith.constant 0 : i32
    %c0_i32_0 = arith.constant 0 : i32
    return %c0_i32, %arg0 : i32, i32
  }
  func.func @transform_1(%arg0: i32) -> (i32, i32) {
    %c0_i32 = arith.constant 0 : i32
    %c0_i32_0 = arith.constant 0 : i32
    return %c0_i32, %arg0 : i32, i32
  }
  func.func @transform_2(%arg0: i32) -> (i32, i32) {
    %c0_i32 = arith.constant 0 : i32
    %c0_i32_0 = arith.constant 0 : i32
    %c0_i32_1 = arith.constant 0 : i32
    return %c0_i32, %c0_i32_0 : i32, i32
  }
  func.func @transform_3(%arg0: i32) -> (i32, i32) {
    %c0_i32 = arith.constant 0 : i32
    %c0_i32_0 = arith.constant 0 : i32
    %c0_i32_1 = arith.constant 0 : i32
    return %c0_i32, %c0_i32_0 : i32, i32
  }
  func.func @transform_4(%arg0: i32) -> (i32, i32) {
    %c0_i32 = arith.constant 0 : i32
    %c0_i32_0 = arith.constant 0 : i32
    %c0_i32_1 = arith.constant 0 : i32
    return %c0_i32, %c0_i32_0 : i32, i32
  }
  func.func @transform_5(%arg0: i32) -> (i32, i32) {
    %c0_i32 = arith.constant 0 : i32
    %c0_i32_0 = arith.constant 0 : i32
    %c0_i32_1 = arith.constant 0 : i32
    return %c0_i32, %c0_i32_0 : i32, i32
  }
  func.func @transform_6(%arg0: i32) -> (i32, i32) {
    %c0_i32 = arith.constant 0 : i32
    %c0_i32_0 = arith.constant 0 : i32
    return %c0_i32, %arg0 : i32, i32
  }
}

</mosaic_0001>

<bundles_post_ra>
// kernel: tpu_custom_call.1
= control target key start
LH: loop header
LB: loop body
LE: loop exit
PB: predicated region body
PF: predicated region fallthrough
CT: control target
= control target key end

     0   :  { %vm250_vm0 = vcmask 64512   ;;  %vm44_vm1 = vcmask 146432   ;;  %vm93_vm2 = vcmask 1041408   ;;  %s1073_s0 = inlined_call_operand.vmem [shape: f32[8,128], index: 0, kind: input, shape index: {}]   ;;  %s1074_s1 = inlined_call_operand.vmem [shape: f32[18,128], index: 1, kind: input, shape index: {}]   ;;  %s1075_s2 = inlined_call_operand.vmem [shape: f32[64,8], index: 2, kind: input, shape index: {}]   ;;  %s1076_s3 = inlined_call_operand.vmem [shape: f32[32,16], index: 3, kind: input, shape index: {}]   ;;  %s1077_s4 = inlined_call_operand.vmem [shape: f32[32,8], index: 4, kind: input, shape index: {}]   ;;  %s1078_s5 = inlined_call_operand.vmem [shape: f32[128,18], index: 5, kind: input, shape index: {}]   ;;  %s1079_s6 = inlined_call_operand.hbm [shape: f32[18,128], index: 6, kind: output, shape index: {}]  }
   0x1   :  { %v25_v0 = vld [vmem:[%s1074_s1] sm:$0xff]  ;;  %v26_v1 = vld [vmem:[%s1074_s1 + $0x8] sm:$0xff]  ;;  %v27_v6 = vld [vmem:[%s1074_s1 + $0x10] sm:$0x3] }
   0x2   :  { %v24_v2 = vld [vmem:[%s1073_s0] sm:$0xff]  ;;  %v797_v3 = vpack.c.bf16 %v26_v1, %v25_v0  ;;  %v243_v7 = vld [vmem:[%s1075_s2 + $0x8] sm:$0xff]  ;;  %v244_v8 = vld [vmem:[%s1075_s2 + $0x10] sm:$0xff] }
   0x3   :  { %765 = vmatprep.subr.mxu0 %v24_v2  ;;  %v242_v4 = vld [vmem:[%s1075_s2] sm:$0xff]  ;;  %v245_v9 = vld [vmem:[%s1075_s2 + $0x18] sm:$0xff]  ;;  %v29_v10 = vld [vmem:[%s1078_s5 + $0x8] sm:$0xff] }
   0x4   :  { %v28_v5 = vld [vmem:[%s1078_s5] sm:$0xff]  ;;  %766 = vmatpush3.msra.mxu0 %v24_v2  ;;  %767 = vmatprep.mubr.msk.f32.mxu0 %vm250_vm0, %v242_v4 }
   0x5   :  { %798 = vmatprep.subr.bf16.mxu1 %v797_v3  ;;  %741 = vmatprep.mubr.msk.f32.mxu1 %vm44_vm1, %v28_v5  ;;  %v246_v11 = vld [vmem:[%s1075_s2 + $0x20] sm:$0xff] }
   0x6   :  { %800 = vmatpush3.bf16.msra.mxu1 %v797_v3  ;;  %768 = vmatmul.mubr.msk.f32.vlgmr.msra.gmra.mrb[0].mxu0 %vm250_vm0, %v243_v7 }
   0x7   :  { %739 = vmatprep.subr.msk.mxu1 %vm93_vm2, %v27_v6  ;;  %770 = vmatprep.mubr.msk.f32.mxu0 %vm250_vm0, %v244_v8 }
   0x8   :  { %11 = vsyncpa [#allocation3], 0  ;;  %v30_v12 = vld [vmem:[%s1078_s5 + $0x10] sm:$0xff]  ;;  %v247_v13 = vld [vmem:[%s1075_s2 + $0x28] sm:$0xff]  ;;  %vm408_vm3 = vcmask 130048   ;;  %vm638_vm4 = vcmask 1040384  }
   0x9   :  { %v31_v14 = vld [vmem:[%s1078_s5 + $0x18] sm:$0xff]  ;;  %v248_v15 = vld [vmem:[%s1075_s2 + $0x30] sm:$0xff]  ;;  %v32_v16 = vld [vmem:[%s1078_s5 + $0x20] sm:$0xff] }
   0xa   :  { %740 = vmatpush3.msk.msra.mxu1 %vm93_vm2, %v27_v6  ;;  %771 = vmatmul.mubr.msk.f32.gmra.mrb[2].mxu0 %vm250_vm0, %v245_v9  ;;  %v249_v17 = vld [vmem:[%s1075_s2 + $0x38] sm:$0xff]  ;;  %v33_v18 = vld [vmem:[%s1078_s5 + $0x28] sm:$0xff]  ;;  %v34_v19 = vld [vmem:[%s1078_s5 + $0x30] sm:$0xff] }
   0xb   :  { %742 = vmatmul.mubr.msk.f32.vlgmr.msra.gmra.mrb[0].mxu1 %vm44_vm1, %v29_v10  ;;  %773 = vmatprep.mubr.msk.f32.mxu0 %vm250_vm0, %v246_v11  ;;  %v35_v20 = vld [vmem:[%s1078_s5 + $0x38] sm:$0xff]  ;;  %v36_v21 = vld [vmem:[%s1078_s5 + $0x40] sm:$0xff]  ;;  %v37_v23 = vld [vmem:[%s1078_s5 + $0x48] sm:$0xff] }
   0xc   :  { %744 = vmatprep.mubr.msk.f32.mxu1 %vm44_vm1, %v30_v12  ;;  %v404_v22 = vld [vmem:[%s1076_s3] sm:$0xff]  ;;  %v38_v24 = vld [vmem:[%s1078_s5 + $0x50] sm:$0xff]  ;;  %v39_v25 = vld [vmem:[%s1078_s5 + $0x58] sm:$0xff] }
   0xd   :  { %v405_v7 = vld [vmem:[%s1076_s3 + $0x8] sm:$0xff]  ;;  %v406_v8 = vld [vmem:[%s1076_s3 + $0x10] sm:$0xff]  ;;  %v407_v9 = vld [vmem:[%s1076_s3 + $0x18] sm:$0xff] }
   0xe   :  { %774 = vmatmul.mubr.msk.f32.gmra.mrb[4].mxu0 %vm250_vm0, %v247_v13 }
   0xf   :  { %745 = vmatmul.mubr.msk.f32.gmra.mrb[2].mxu1 %vm44_vm1, %v31_v14  ;;  %776 = vmatprep.mubr.msk.f32.mxu0 %vm250_vm0, %v248_v15  ;;  %v40_v14 = vld [vmem:[%s1078_s5 + $0x60] sm:$0xff] }
  0x10   :  { %747 = vmatprep.mubr.msk.f32.mxu1 %vm44_vm1, %v32_v16  ;;  %v518_v15 = vld [vmem:[%s1077_s4] sm:$0xff]  ;;  %v41_v16 = vld [vmem:[%s1078_s5 + $0x68] sm:$0xff] }
  0x12   :  { %777 = vmatmul.mubr.msk.f32.gmra.mrb[6].mxu0 %vm250_vm0, %v249_v17  ;;  %v42_v17 = vld [vmem:[%s1078_s5 + $0x70] sm:$0xff] }
  0x13   :  { %748 = vmatmul.mubr.msk.f32.gmra.mrb[4].mxu1 %vm44_vm1, %v33_v18  ;;  %783 = vmatprep.mubr.msk.f32.mxu0 %vm408_vm3, %v404_v22  ;;  %v43_v18 = vld [vmem:[%s1078_s5 + $0x78] sm:$0xff] }
  0x14   :  { %750 = vmatprep.mubr.msk.f32.mxu1 %vm44_vm1, %v34_v19 }
  0x17   :  { %751 = vmatmul.mubr.msk.f32.gmra.mrb[6].mxu1 %vm44_vm1, %v35_v20 }
  0x18   :  { %753 = vmatprep.mubr.msk.f32.mxu1 %vm44_vm1, %v36_v21 }
  0x1b   :  { %754 = vmatmul.mubr.msk.f32.gmra.mrb[8].mxu1 %vm44_vm1, %v37_v23 }
  0x1c   :  { %756 = vmatprep.mubr.msk.f32.mxu1 %vm44_vm1, %v38_v24 }
  0x1f   :  { %757 = vmatmul.mubr.msk.f32.gmra.mrb[10].mxu1 %vm44_vm1, %v39_v25 }
  0x20   :  { %759 = vmatprep.mubr.msk.f32.mxu1 %vm44_vm1, %v40_v14 }
  0x23   :  { %760 = vmatmul.mubr.msk.f32.gmra.mrb[12].mxu1 %vm44_vm1, %v41_v16 }
  0x24   :  { %762 = vmatprep.mubr.msk.f32.mxu1 %vm44_vm1, %v42_v17 }
  0x27   :  { %763 = vmatmul.mubr.msk.f32.gmra.mrb[14].mxu1 %vm44_vm1, %v43_v18 }
  0xd9   :  { %v769_v26 = vpop.f32.mrb[0].mxu0 }
  0xda   :  { %v341_v27 = vpop.f32.mrb[1].mxu0 }
  0xdd   :  { %v772_v28 = vpop.f32.mrb[2].mxu0 }
  0xde   :  { %v743_v29 = vpop.f32.mrb[0].mxu1  ;;  %v351_v30 = vpop.f32.mrb[3].mxu0 }
  0xdf   :  { %v347_v31 = vadd.f32 %v769_v26, %v743_v29  ;;  %v163_v32 = vpop.f32.mrb[1].mxu1 }
  0xe0   :  { %v342_v33 = vadd.f32 %v341_v27, %v163_v32 }
  0xe1   :  { %v775_v34 = vpop.f32.mrb[4].mxu0  ;;  %824 = vtanh.f32 %v347_v31 }
  0xe2   :  { %v746_v35 = vpop.f32.mrb[2].mxu1  ;;  %v361_v36 = vpop.f32.mrb[5].mxu0  ;;  %826 = vtanh.f32 %v342_v33 }
  0xe3   :  { %v357_v37 = vadd.f32 %v772_v28, %v746_v35  ;;  %v173_v38 = vpop.f32.mrb[3].mxu1 }
  0xe4   :  { %v352_v39 = vadd.f32 %v351_v30, %v173_v38  ;;  %v519_v38 = vld [vmem:[%s1077_s4 + $0x8] sm:$0xff] }
  0xe5   :  { %828 = vtanh.f32 %v357_v37  ;;  %v778_v40 = vpop.f32.mrb[6].mxu0 }
  0xe6   :  { %830 = vtanh.f32 %v352_v39  ;;  %v749_v41 = vpop.f32.mrb[4].mxu1  ;;  %v371_v42 = vpop.f32.mrb[7].mxu0  ;;  %v520_v39 = vld [vmem:[%s1077_s4 + $0x10] sm:$0xff] }
  0xe7   :  { %v367_v43 = vadd.f32 %v775_v34, %v749_v41  ;;  %v183_v44 = vpop.f32.mrb[5].mxu1  ;;  %v521_v41 = vld [vmem:[%s1077_s4 + $0x18] sm:$0xff]  ;;  %s880_s4 = smov [#allocation2]  }
  0xe8   :  { %v362_v45 = vadd.f32 %v361_v36, %v183_v44  ;;  %s648_s1 = sshll.u32 %s880_s4, 4  ;;  %s649_s1 = int_to_ptr.vmem [resolvable:$true] %s648_s1 }
  0xe9   :  { %v685_v46 = vmul.f32 -1.442695, %v367_v43  ;;  %s856_s12 = scalar_lea.vmem %s649_s1, 384  ;;  %p861_p1 = scmp.lt.s32.totalorder %s649_s1, %s649_s1 }
  0xea   :  { %v684_v47 = vmul.f32 -1.442695, %v362_v45  ;;  %v752_v48 = vpop.f32.mrb[6].mxu1  ;;  %p857_p0 = scmp.ne.s32.totalorder %s649_s1, %s856_s12  ;;  %p862_p2 = scmp.lt.s32.totalorder %s856_s12, %s856_s12 }
  0xeb   :  { %832 = vpow2.f32 %v685_v46  ;;  %v377_v49 = vadd.f32 %v778_v40, %v752_v48  ;;  %v193_v50 = vpop.f32.mrb[7].mxu1  ;;  %v825_v52 = vpop.eup %824 }
  0xec   :  { %834 = vpow2.f32 %v684_v47  ;;  %v372_v51 = vadd.f32 %v371_v42, %v193_v50  ;;  %v827_v53 = vpop.eup %826  ;;  %p863_p3 = por %p862_p2, %p861_p1 }
  0xee   :  { %v755_v10 = vpop.f32.mrb[8].mxu1  ;;  %p864_p4 = pnand %p863_p3, %p857_p0 }
  0xef   :  { %v829_v54 = vpop.eup %828  ;;  %v203_v11 = vpop.f32.mrb[9].mxu1 }
  0xf0   :  { %v831_v55 = vpop.eup %830  ;;  %v397_v56 = vsub.f32 %v829_v54, %v825_v52 }
  0xf1   :  { %v396_v57 = vsub.f32 %v831_v55, %v827_v53 }
  0xf2   :  { %v758_v12 = vpop.f32.mrb[10].mxu1 }
  0xf3   :  { %v213_v13 = vpop.f32.mrb[11].mxu1 }
  0xf5   :  { %v833_v58 = vpop.eup %832 }
  0xf6   :  { %v835_v59 = vpop.eup %834  ;;  %v391_v60 = vadd.f32 1.0, %v833_v58  ;;  %v761_v42 = vpop.f32.mrb[12].mxu1 }
  0xf7   :  { %v390_v61 = vadd.f32 1.0, %v835_v59  ;;  %v223_v43 = vpop.f32.mrb[13].mxu1 }
  0xf8   :  { %836 = vrcp.f32 %v391_v60 }
  0xf9   :  { %838 = vrcp.f32 %v390_v61 }
  0xfa   :  { %v764_v44 = vpop.f32.mrb[14].mxu1 }
  0xfb   :  { %v233_v45 = vpop.f32.mrb[15].mxu1 }
 0x102   :  { %v837_v62 = vpop.eup %836 }
 0x103   :  { %v839_v63 = vpop.eup %838  ;;  %v399_v0 = vmul.f32 %v837_v62, %v397_v56 }
 0x104   :  { %v398_v1 = vmul.f32 %v839_v63, %v396_v57 }
 0x105   :  { %v401_v2 = vadd.f32 %v825_v52, %v399_v0 }
 0x106   :  { %v400_v3 = vadd.f32 %v827_v53, %v398_v1 }
 0x107   :  { %v403_v4 = vadd.f32 %v401_v2, %v377_v49 }
 0x108   :  { %v402_v5 = vadd.f32 %v400_v3, %v372_v51  ;;  %640 = vst [vmem:[#allocation2] sm:$0xff] %v400_v3 }
 0x10a   :  { %v801_v6 = vpack.c.bf16 %v403_v4, %v402_v5 }
 0x10c   :  { %802 = vmatprep.subr.bf16.mxu0 %v801_v6 }
 0x10d   :  { %804 = vmatpush3.bf16.msra.mxu0 %v801_v6 }
 0x110   :  { %784 = vmatmul.mubr.msk.f32.vlgmr.msra.gmra.mrb[8].mxu0 %vm408_vm3, %v405_v7 }
 0x111   :  { %786 = vmatprep.mubr.msk.f32.mxu0 %vm408_vm3, %v406_v8 }
 0x114   :  { %787 = vmatmul.mubr.msk.f32.gmra.mrb[10].mxu0 %vm408_vm3, %v407_v9 }
 0x115   :  { %791 = vmatprep.mubr.msk.f32.mxu0 %vm250_vm0, %v518_v15 }
 0x1e3   :  { %v785_v19 = vpop.f32.mrb[8].mxu0 }
 0x1e4   :  { %v493_v20 = vadd.f32 %v785_v19, %v755_v10  ;;  %v487_v21 = vpop.f32.mrb[9].mxu0 }
 0x1e5   :  { %v488_v22 = vadd.f32 %v487_v21, %v203_v11 }
 0x1e6   :  { %840 = vtanh.f32 %v493_v20 }
 0x1e7   :  { %842 = vtanh.f32 %v488_v22  ;;  %v788_v23 = vpop.f32.mrb[10].mxu0 }
 0x1e8   :  { %v503_v24 = vadd.f32 %v788_v23, %v758_v12  ;;  %v497_v25 = vpop.f32.mrb[11].mxu0 }
 0x1e9   :  { %v498_v26 = vadd.f32 %v497_v25, %v213_v13 }
 0x1eb   :  { %v690_v27 = vmul.f32 -1.442695, %v498_v26 }
 0x1ed   :  { %844 = vpow2.f32 %v690_v27 }
 0x1f0   :  { %v841_v28 = vpop.eup %840 }
 0x1f1   :  { %v843_v29 = vpop.eup %842 }
 0x1f2   :  { %v514_v30 = vsub.f32 %v841_v28, %v843_v29 }
 0x1f7   :  { %v845_v31 = vpop.eup %844 }
 0x1f8   :  { %v511_v32 = vadd.f32 1.0, %v845_v31 }
 0x1fa   :  { %846 = vrcp.f32 %v511_v32 }
 0x204   :  { %v847_v33 = vpop.eup %846 }
 0x205   :  { %v515_v34 = vmul.f32 %v847_v33, %v514_v30 }
 0x207   :  { %v516_v35 = vadd.f32 %v843_v29, %v515_v34 }
 0x209   :  { %v517_v36 = vadd.f32 %v516_v35, %v503_v24  ;;  %v632_v37 = vrot.slane %v516_v35, 6 }
 0x20b   :  { %789 = vmatprep.subr.mxu0 %v517_v36  ;;  %v637_v40 = vsel %vm93_vm2, %v401_v2, %v632_v37 }
 0x20c   :  { %790 = vmatpush3.msra.mxu0 %v517_v36  ;;  %641 = vst [vmem:[#allocation2 + $0x8] sm:$0xff] %v637_v40 }
 0x20d   :  { %792 = vmatmul.mubr.msk.f32.vlgmr.msra.gmra.mrb[12].mxu0 %vm250_vm0, %v519_v38 }
 0x20e   :  { %794 = vmatprep.mubr.msk.f32.mxu0 %vm250_vm0, %v520_v39 }
 0x211   :  { %795 = vmatmul.mubr.msk.f32.gmra.mrb[14].mxu0 %vm250_vm0, %v521_v41 }
 0x2e0   :  { %v793_v46 = vpop.f32.mrb[12].mxu0 }
 0x2e1   :  { %v606_v47 = vadd.f32 %v793_v46, %v761_v42  ;;  %v600_v48 = vpop.f32.mrb[13].mxu0 }
 0x2e2   :  { %v601_v49 = vadd.f32 %v600_v48, %v223_v43 }
 0x2e3   :  { %848 = vtanh.f32 %v606_v47 }
 0x2e4   :  { %850 = vtanh.f32 %v601_v49  ;;  %v796_v50 = vpop.f32.mrb[14].mxu0 }
 0x2e5   :  { %v616_v51 = vadd.f32 %v796_v50, %v764_v44  ;;  %v610_v52 = vpop.f32.mrb[15].mxu0 }
 0x2e6   :  { %v611_v53 = vadd.f32 %v610_v52, %v233_v45 }
 0x2e8   :  { %v695_v54 = vmul.f32 -1.442695, %v611_v53 }
 0x2ea   :  { %852 = vpow2.f32 %v695_v54 }
 0x2ed   :  { %v849_v55 = vpop.eup %848 }
 0x2ee   :  { %v851_v56 = vpop.eup %850 }
 0x2ef   :  { %v627_v57 = vsub.f32 %v849_v55, %v851_v56 }
 0x2f4   :  { %v853_v58 = vpop.eup %852 }
 0x2f5   :  { %v624_v59 = vadd.f32 1.0, %v853_v58 }
 0x2f7   :  { %854 = vrcp.f32 %v624_v59 }
 0x301   :  { %v855_v60 = vpop.eup %854 }
 0x302   :  { %v628_v61 = vmul.f32 %v855_v60, %v627_v57 }
 0x304   :  { %v629_v62 = vadd.f32 %v851_v56, %v628_v61 }
 0x306   :  { %v630_v63 = vadd.f32 %v629_v62, %v616_v51 }
 0x308   :  { %v635_v0 = vrot.slane %v630_v63, 7 }
 0x30a   :  { %v639_v1 = vsel %vm638_vm4, %v629_v62, %v635_v0 }
 0x30b   :  { %642 = vst [vmem:[#allocation2 + $0x10] sm:$0x3] %v639_v1 }
 0x30c   :  { %867 = shalt.err (!%p864_p4)
}
 0x30d   :  { %s868_s15 = scalar_lea.hbm %s1079_s6, 384 }
 0x30e   :  { %p869_p5 = scmp.ne.s32.totalorder %s1079_s6, %s868_s15  ;;  %p872_p6 = scmp.lt.u32.totalorder %s868_s15, %s1079_s6 }
 0x310   :  { %p874_p7 = pnand %p872_p6, %p869_p5 }
 0x312   :  { %877 = shalt.err (!%p874_p7)
}
 0x313   :  { %s881_s20 = smov 128   ;;  %s882_s21 = smov 8  }
 0x314   :  { %654 = dma.vmem_to_hbm [thread:$0]  %s649_s1, 384, %s1079_s6, [#allocation3], %s881_s20, %s881_s20, %s882_s21  }
 0x315   :  { %878 = dma.done.wait [#allocation3], 384  }
 0x316   :  { %879 = vsyncadd [#allocation3], 4294966912 }
 0x317   :  { %658 = vsyncpa [#allocation3], 1 }

</bundles_post_ra>
